<compile_context>
chip_gen: v5e
topology: v5e:2x2
jax: 0.10.0
libtpu: 0.0.40
codegen_flags: <defaults>
</compile_context>

<pallas_src>
import math

import jax
import jax.numpy as jnp
from jax import lax
from jax.experimental import pallas as pl
from jax.experimental.pallas import tpu as pltpu


# ----------------------------------------------------------------------------
# Wrapper (glue = layout plumbing only) + Pallas kernel.
# ----------------------------------------------------------------------------
def optimized_block_forward(x_nchw, params):
    """OptimizedBlock forward: (B, Cin, H, W) -> (B, Cout, H/2, W/2)."""
    w1, b1 = params["w1"], params["b1"]
    w2, b2 = params["w2"], params["b2"]
    wsc, bsc = params["wsc"], params["bsc"]

    B, Cin, H, W = x_nchw.shape
    Cout = w1.shape[0]
    assert H % 2 == 0 and W % 2 == 0
    HW, HW4 = H * W, (H // 2) * (W // 2)
    L, L4 = B * HW, B * HW4                       # lane extents before/after pooling
    f32, bf16 = jnp.float32, jnp.bfloat16

    # --- NCHW -> (C, B*H*W): channels on sublanes, flattened (b, i, j) on lanes.
    x_flat = jnp.transpose(x_nchw, (1, 0, 2, 3)).reshape(Cin, L).astype(f32)

    # torch (Cout, Cin, 3, 3) -> (Cout, 9*Cin), column = t*Cin + ci, t = (dy+1)*3+(dx+1)
    w1_k = jnp.transpose(w1, (0, 2, 3, 1)).reshape(Cout, 9 * Cin).astype(f32)
    w2_k = jnp.transpose(w2, (0, 2, 3, 1)).reshape(Cout, 9 * Cout).astype(f32)
    wsc_k = wsc.reshape(Cout, Cin).astype(f32)
    # Fold the 1x1 shortcut into conv2:  avg_pool(Wsc x + bsc) == Wsc avg_pool(x) + bsc,
    # so pre-pool total = [W2 | Wsc] @ [patch2 ; x] + (b2 + bsc).
    w2sc_k = jnp.concatenate([w2_k, wsc_k], axis=1)                 # (Cout, 9*Cout+Cin)
    b1_k = b1.reshape(Cout, 1).astype(f32)
    b2sc_k = (b2 + bsc).reshape(Cout, 1).astype(f32)

    # --- per-tap validity masks (implements the zero padding of both 3x3 convs)
    p = jnp.arange(L)
    ii = (p % HW) // W
    jj = p % W
    masks = []
    for t in range(9):
        dy, dx = t // 3 - 1, t % 3 - 1
        masks.append((ii + dy >= 0) & (ii + dy < H) & (jj + dx >= 0) & (jj + dx < W))
    mask_arr = jnp.stack(masks, axis=0).astype(f32)                 # (9, L)

    # --- 2x2 average pool as a (L, L4) matmul, block-diagonal over batch (exact in bf16)
    bb = p // HW
    q = jnp.arange(L4)
    qb, qi, qj = q // HW4, (q % HW4) // (W // 2), q % (W // 2)
    pool = ((bb[:, None] == qb[None, :]) &
            ((ii // 2)[:, None] == qi[None, :]) &
            ((jj // 2)[:, None] == qj[None, :])).astype(f32) * 0.25
    pool = pool.astype(bf16)                                        # entries are 0 / 0.25

    def _rot_lanes(v, d):
        # v: (C, L) -> u with u[:, p] = v[:, (p + d) mod L]  (static lane rotation)
        s = d % L
        if s == 0:
            return v
        return jnp.concatenate([v[:, s:], v[:, :s]], axis=1)

    def kernel(x_ref, w1_ref, b1_ref, w2sc_ref, b2sc_ref, mask_ref, pool_ref, o_ref):
        x = x_ref[...]                                              # (Cin, L)  f32
        msk = mask_ref[...]                                         # (9, L)    f32

        def taps_of(h):
            # 9 shifted + border-masked copies of h (C, L): im2col in-register.
            out = []
            for t in range(9):
                dy, dx = t // 3 - 1, t % 3 - 1
                tap = _rot_lanes(h, dy * W + dx)
                if t != 4:                                          # center tap: no mask
                    tap = tap * msk[t:t + 1, :]
                out.append(tap)
            return out

        # conv1: single fused (Cout, 9*Cin) @ (9*Cin, L) MXU matmul, bf16 in / f32 acc.
        patch1 = jnp.concatenate(taps_of(x), axis=0).astype(bf16)
        h1 = jnp.dot(w1_ref[...].astype(bf16), patch1,
                     preferred_element_type=f32) + b1_ref[...]
        h1 = jnp.maximum(h1, 0.0)                                   # ReLU (f32)

        # conv2 + fused 1x1 shortcut: (Cout, 9*Cout+Cin) @ (9*Cout+Cin, L).
        patch2 = jnp.concatenate(taps_of(h1) + [x], axis=0).astype(bf16)
        pre = jnp.dot(w2sc_ref[...].astype(bf16), patch2,
                      preferred_element_type=f32) + b2sc_ref[...]

        # 2x2 average pool as matmul -> one lane-dense (Cout, L4) store.
        o_ref[...] = jnp.dot(pre.astype(bf16), pool_ref[...],
                             preferred_element_type=f32)

    operands = (x_flat, w1_k, b1_k, w2sc_k, b2sc_k, mask_arr, pool)
    flops = (2 * Cout * (9 * Cin) * L
             + 2 * Cout * (9 * Cout + Cin) * L
             + 2 * Cout * L * L4)
    bytes_accessed = sum(int(a.size) * a.dtype.itemsize for a in operands) + Cout * L4 * 4

    out = pl.pallas_call(
        kernel,
        out_shape=jax.ShapeDtypeStruct((Cout, L4), f32),
        grid=(1,),
        in_specs=[
            pl.BlockSpec((Cin, L), lambda g: (0, 0)),
            pl.BlockSpec((Cout, 9 * Cin), lambda g: (0, 0)),
            pl.BlockSpec((Cout, 1), lambda g: (0, 0)),
            pl.BlockSpec((Cout, 9 * Cout + Cin), lambda g: (0, 0)),
            pl.BlockSpec((Cout, 1), lambda g: (0, 0)),
            pl.BlockSpec((9, L), lambda g: (0, 0)),
            pl.BlockSpec((L, L4), lambda g: (0, 0)),
        ],
        out_specs=pl.BlockSpec((Cout, L4), lambda g: (0, 0)),
        compiler_params=pltpu.CompilerParams(dimension_semantics=("arbitrary",)),
        cost_estimate=pl.CostEstimate(flops=flops, transcendentals=0,
                                      bytes_accessed=bytes_accessed),
    )(*operands)

    # (Cout, B*H/2*W/2) -> NCHW
    return jnp.transpose(out.reshape(Cout, B, H // 2, W // 2), (1, 0, 2, 3))


# ----------------------------------------------------------------------------
# Deterministic parameter setup (mirrors OptimizedBlock._initialize + conv bias).
# ----------------------------------------------------------------------------
def xavier_uniform(key, shape, gain):
    fan_out = shape[0] * shape[2] * shape[3]
    fan_in = shape[1] * shape[2] * shape[3]
    bound = gain * math.sqrt(6.0 / (fan_in + fan_out))
    return jax.random.uniform(key, shape, jnp.float32, -bound, bound)


def conv_bias_init(key, out_ch, fan_in):
    bound = 1.0 / math.sqrt(fan_in)
    return jax.random.uniform(key, (out_ch,), jnp.float32, -bound, bound)


def spectral_normalize(w, key, n_iter=50):
    # TODO(synk): PyTorch's utils.spectral_norm does one stateful power-iteration step
    # per forward; here sigma is estimated by running the iteration to (near) convergence.
    w2d = w.reshape(w.shape[0], -1)
    u = jax.random.normal(key, (w2d.shape[0],), jnp.float32)
    u = u / (jnp.linalg.norm(u) + 1e-12)
    v = w2d.T @ u
    for _ in range(n_iter):
        v = w2d.T @ u
        v = v / (jnp.linalg.norm(v) + 1e-12)
        u = w2d @ v
        u = u / (jnp.linalg.norm(u) + 1e-12)
    sigma = u @ (w2d @ v)
    return w / sigma


# ----------------------------------------------------------------------------
# Pure-JAX reference (ground truth at HIGHEST precision) for verification.
# ----------------------------------------------------------------------------
def ref_forward(x, p):
    dn = ("NCHW", "OIHW", "NCHW")
    hp = lax.Precision.HIGHEST

    def conv(x, w, b, pad):
        y = lax.conv_general_dilated(x, w, (1, 1), [(pad, pad), (pad, pad)],
                                     dimension_numbers=dn, precision=hp)
        return y + b[None, :, None, None]

    def avg_pool2(x):
        N, C, H, W = x.shape
        return x.reshape(N, C, H // 2, 2, W // 2, 2).mean(axis=(3, 5))

    h = jnp.maximum(conv(x, p["w1"], p["b1"], 1), 0.0)
    res = avg_pool2(conv(h, p["w2"], p["b2"], 1))
    sc = conv(avg_pool2(x), p["wsc"], p["bsc"], 0)
    return sc + res


if __name__ == "__main__":
    key = jax.random.PRNGKey(0)
    in_ch, out_ch, B, H, W = 4, 8, 2, 16, 16
    ks = jax.random.split(key, 10)

    w1 = spectral_normalize(
        xavier_uniform(ks[0], (out_ch, in_ch, 3, 3), math.sqrt(2)), ks[1])
    w2 = spectral_normalize(
        xavier_uniform(ks[2], (out_ch, out_ch, 3, 3), math.sqrt(2)), ks[3])
    wsc = spectral_normalize(
        xavier_uniform(ks[4], (out_ch, in_ch, 1, 1), 1.0), ks[5])
    b1 = conv_bias_init(ks[6], out_ch, in_ch * 9)
    b2 = conv_bias_init(ks[7], out_ch, out_ch * 9)
    bsc = conv_bias_init(ks[8], out_ch, in_ch)
    params = dict(w1=w1, b1=b1, w2=w2, b2=b2, wsc=wsc, bsc=bsc)

    x = jax.random.normal(ks[9], (B, in_ch, H, W), jnp.float32)

    fwd = jax.jit(optimized_block_forward)
    out = jax.block_until_ready(fwd(x, params))

    ref = ref_forward(x, params)
    assert out.shape == (B, out_ch, H // 2, W // 2), out.shape
    # Kernel feeds the MXU bf16 operands (f32 accumulation); reference is f32 HIGHEST,
    # so the tolerance is loosened accordingly (per review guidance).
    err = float(jnp.max(jnp.abs(out - ref)))
    assert jnp.allclose(out, ref, atol=5e-2, rtol=5e-2), err
    print("KERNEL_OK")
</pallas_src>

<mosaic_0001>
module attributes {stable_mosaic.version = 11 : i64} {
  func.func @kernel(%arg0: i32, %arg1: memref<4x512xf32, #tpu.memory_space<vmem>>, %arg2: memref<8x36xf32, #tpu.memory_space<vmem>>, %arg3: memref<8x1xf32, #tpu.memory_space<vmem>>, %arg4: memref<8x76xf32, #tpu.memory_space<vmem>>, %arg5: memref<8x1xf32, #tpu.memory_space<vmem>>, %arg6: memref<9x512xf32, #tpu.memory_space<vmem>>, %arg7: memref<512x128xbf16, #tpu.memory_space<vmem>>, %arg8: memref<8x128xf32, #tpu.memory_space<vmem>>) attributes {dimension_semantics = [#tpu.dimension_semantics<arbitrary>], iteration_bounds = array<i64: 1>, scalar_prefetch = 0 : i64, scratch_operands = 0 : i64, tpu.core_type = #tpu.core_type<tc>, window_params = [{pipeline_mode = #tpu.pipeline_mode<synchronous>, transform_indices = @transform_0, window_bounds = array<i64: 4, 512>}, {pipeline_mode = #tpu.pipeline_mode<synchronous>, transform_indices = @transform_1, window_bounds = array<i64: 8, 36>}, {pipeline_mode = #tpu.pipeline_mode<synchronous>, transform_indices = @transform_2, window_bounds = array<i64: 8, 1>}, {pipeline_mode = #tpu.pipeline_mode<synchronous>, transform_indices = @transform_3, window_bounds = array<i64: 8, 76>}, {pipeline_mode = #tpu.pipeline_mode<synchronous>, transform_indices = @transform_4, window_bounds = array<i64: 8, 1>}, {pipeline_mode = #tpu.pipeline_mode<synchronous>, transform_indices = @transform_5, window_bounds = array<i64: 9, 512>}, {pipeline_mode = #tpu.pipeline_mode<synchronous>, transform_indices = @transform_6, window_bounds = array<i64: 512, 128>}, {pipeline_mode = #tpu.pipeline_mode<synchronous>, transform_indices = @transform_7, window_bounds = array<i64: 8, 128>}]} {
    %c0 = arith.constant 0 : index
    %c0_0 = arith.constant 0 : index
    %0 = vector.load %arg1[%c0, %c0_0] : memref<4x512xf32, #tpu.memory_space<vmem>>, vector<4x512xf32>
    %c0_1 = arith.constant 0 : index
    %c0_2 = arith.constant 0 : index
    %1 = vector.load %arg6[%c0_1, %c0_2] : memref<9x512xf32, #tpu.memory_space<vmem>>, vector<9x512xf32>
    %2 = vector.extract_strided_slice %0 {offsets = [0, 495], sizes = [4, 17], strides = [1, 1]} : vector<4x512xf32> to vector<4x17xf32>
    %3 = vector.extract_strided_slice %0 {offsets = [0, 0], sizes = [4, 495], strides = [1, 1]} : vector<4x512xf32> to vector<4x495xf32>
    %4 = tpu.concatenate %2, %3 in 1 : vector<4x17xf32>, vector<4x495xf32> -> vector<4x512xf32>
    %5 = vector.extract_strided_slice %1 {offsets = [0, 0], sizes = [1, 512], strides = [1, 1]} : vector<9x512xf32> to vector<1x512xf32>
    %6 = vector.broadcast %5 : vector<1x512xf32> to vector<4x512xf32>
    %7 = arith.mulf %4, %6 : vector<4x512xf32>
    %8 = vector.extract_strided_slice %0 {offsets = [0, 496], sizes = [4, 16], strides = [1, 1]} : vector<4x512xf32> to vector<4x16xf32>
    %9 = vector.extract_strided_slice %0 {offsets = [0, 0], sizes = [4, 496], strides = [1, 1]} : vector<4x512xf32> to vector<4x496xf32>
    %10 = tpu.concatenate %8, %9 in 1 : vector<4x16xf32>, vector<4x496xf32> -> vector<4x512xf32>
    %11 = vector.extract_strided_slice %1 {offsets = [1, 0], sizes = [1, 512], strides = [1, 1]} : vector<9x512xf32> to vector<1x512xf32>
    %12 = vector.broadcast %11 : vector<1x512xf32> to vector<4x512xf32>
    %13 = arith.mulf %10, %12 : vector<4x512xf32>
    %14 = vector.extract_strided_slice %0 {offsets = [0, 497], sizes = [4, 15], strides = [1, 1]} : vector<4x512xf32> to vector<4x15xf32>
    %15 = vector.extract_strided_slice %0 {offsets = [0, 0], sizes = [4, 497], strides = [1, 1]} : vector<4x512xf32> to vector<4x497xf32>
    %16 = tpu.concatenate %14, %15 in 1 : vector<4x15xf32>, vector<4x497xf32> -> vector<4x512xf32>
    %17 = vector.extract_strided_slice %1 {offsets = [2, 0], sizes = [1, 512], strides = [1, 1]} : vector<9x512xf32> to vector<1x512xf32>
    %18 = vector.broadcast %17 : vector<1x512xf32> to vector<4x512xf32>
    %19 = arith.mulf %16, %18 : vector<4x512xf32>
    %20 = vector.extract_strided_slice %0 {offsets = [0, 511], sizes = [4, 1], strides = [1, 1]} : vector<4x512xf32> to vector<4x1xf32>
    %21 = vector.extract_strided_slice %0 {offsets = [0, 0], sizes = [4, 511], strides = [1, 1]} : vector<4x512xf32> to vector<4x511xf32>
    %22 = tpu.concatenate %20, %21 in 1 : vector<4x1xf32>, vector<4x511xf32> -> vector<4x512xf32>
    %23 = vector.extract_strided_slice %1 {offsets = [3, 0], sizes = [1, 512], strides = [1, 1]} : vector<9x512xf32> to vector<1x512xf32>
    %24 = vector.broadcast %23 : vector<1x512xf32> to vector<4x512xf32>
    %25 = arith.mulf %22, %24 : vector<4x512xf32>
    %26 = vector.extract_strided_slice %0 {offsets = [0, 1], sizes = [4, 511], strides = [1, 1]} : vector<4x512xf32> to vector<4x511xf32>
    %27 = vector.extract_strided_slice %0 {offsets = [0, 0], sizes = [4, 1], strides = [1, 1]} : vector<4x512xf32> to vector<4x1xf32>
    %28 = tpu.concatenate %26, %27 in 1 : vector<4x511xf32>, vector<4x1xf32> -> vector<4x512xf32>
    %29 = vector.extract_strided_slice %1 {offsets = [5, 0], sizes = [1, 512], strides = [1, 1]} : vector<9x512xf32> to vector<1x512xf32>
    %30 = vector.broadcast %29 : vector<1x512xf32> to vector<4x512xf32>
    %31 = arith.mulf %28, %30 : vector<4x512xf32>
    %32 = vector.extract_strided_slice %0 {offsets = [0, 15], sizes = [4, 497], strides = [1, 1]} : vector<4x512xf32> to vector<4x497xf32>
    %33 = vector.extract_strided_slice %0 {offsets = [0, 0], sizes = [4, 15], strides = [1, 1]} : vector<4x512xf32> to vector<4x15xf32>
    %34 = tpu.concatenate %32, %33 in 1 : vector<4x497xf32>, vector<4x15xf32> -> vector<4x512xf32>
    %35 = vector.extract_strided_slice %1 {offsets = [6, 0], sizes = [1, 512], strides = [1, 1]} : vector<9x512xf32> to vector<1x512xf32>
    %36 = vector.broadcast %35 : vector<1x512xf32> to vector<4x512xf32>
    %37 = arith.mulf %34, %36 : vector<4x512xf32>
    %38 = vector.extract_strided_slice %0 {offsets = [0, 16], sizes = [4, 496], strides = [1, 1]} : vector<4x512xf32> to vector<4x496xf32>
    %39 = vector.extract_strided_slice %0 {offsets = [0, 0], sizes = [4, 16], strides = [1, 1]} : vector<4x512xf32> to vector<4x16xf32>
    %40 = tpu.concatenate %38, %39 in 1 : vector<4x496xf32>, vector<4x16xf32> -> vector<4x512xf32>
    %41 = vector.extract_strided_slice %1 {offsets = [7, 0], sizes = [1, 512], strides = [1, 1]} : vector<9x512xf32> to vector<1x512xf32>
    %42 = vector.broadcast %41 : vector<1x512xf32> to vector<4x512xf32>
    %43 = arith.mulf %40, %42 : vector<4x512xf32>
    %44 = vector.extract_strided_slice %0 {offsets = [0, 17], sizes = [4, 495], strides = [1, 1]} : vector<4x512xf32> to vector<4x495xf32>
    %45 = vector.extract_strided_slice %0 {offsets = [0, 0], sizes = [4, 17], strides = [1, 1]} : vector<4x512xf32> to vector<4x17xf32>
    %46 = tpu.concatenate %44, %45 in 1 : vector<4x495xf32>, vector<4x17xf32> -> vector<4x512xf32>
    %47 = vector.extract_strided_slice %1 {offsets = [8, 0], sizes = [1, 512], strides = [1, 1]} : vector<9x512xf32> to vector<1x512xf32>
    %48 = vector.broadcast %47 : vector<1x512xf32> to vector<4x512xf32>
    %49 = arith.mulf %46, %48 : vector<4x512xf32>
    %50 = tpu.concatenate %7, %13, %19, %25, %0, %31, %37, %43, %49 in 0 : vector<4x512xf32>, vector<4x512xf32>, vector<4x512xf32>, vector<4x512xf32>, vector<4x512xf32>, vector<4x512xf32>, vector<4x512xf32>, vector<4x512xf32>, vector<4x512xf32> -> vector<36x512xf32>
    %51 = arith.truncf %50 : vector<36x512xf32> to vector<36x512xbf16>
    %c0_3 = arith.constant 0 : index
    %c0_4 = arith.constant 0 : index
    %52 = vector.load %arg2[%c0_3, %c0_4] : memref<8x36xf32, #tpu.memory_space<vmem>>, vector<8x36xf32>
    %53 = arith.truncf %52 : vector<8x36xf32> to vector<8x36xbf16>
    %cst = arith.constant dense<0.000000e+00> : vector<8x512xf32>
    %54 = tpu.matmul %53, %51, %cst {dimension_numbers = #tpu.dot_dimension_numbers<[1], [0], [0], [1], [0, 0, 1, 1], [], []>} : vector<8x36xbf16>, vector<36x512xbf16>, vector<8x512xf32> -> vector<8x512xf32>
    %c0_5 = arith.constant 0 : index
    %c0_6 = arith.constant 0 : index
    %55 = vector.load %arg3[%c0_5, %c0_6] : memref<8x1xf32, #tpu.memory_space<vmem>>, vector<8x1xf32>
    %56 = vector.broadcast %55 : vector<8x1xf32> to vector<8x512xf32>
    %57 = arith.addf %54, %56 : vector<8x512xf32>
    %cst_7 = arith.constant 0.000000e+00 : f32
    %58 = vector.broadcast %cst_7 : f32 to vector<8x512xf32>
    %59 = arith.maximumf %57, %58 : vector<8x512xf32>
    %60 = vector.extract_strided_slice %59 {offsets = [0, 495], sizes = [8, 17], strides = [1, 1]} : vector<8x512xf32> to vector<8x17xf32>
    %61 = vector.extract_strided_slice %59 {offsets = [0, 0], sizes = [8, 495], strides = [1, 1]} : vector<8x512xf32> to vector<8x495xf32>
    %62 = tpu.concatenate %60, %61 in 1 : vector<8x17xf32>, vector<8x495xf32> -> vector<8x512xf32>
    %63 = vector.extract_strided_slice %1 {offsets = [0, 0], sizes = [1, 512], strides = [1, 1]} : vector<9x512xf32> to vector<1x512xf32>
    %64 = vector.broadcast %63 : vector<1x512xf32> to vector<8x512xf32>
    %65 = arith.mulf %62, %64 : vector<8x512xf32>
    %66 = vector.extract_strided_slice %59 {offsets = [0, 496], sizes = [8, 16], strides = [1, 1]} : vector<8x512xf32> to vector<8x16xf32>
    %67 = vector.extract_strided_slice %59 {offsets = [0, 0], sizes = [8, 496], strides = [1, 1]} : vector<8x512xf32> to vector<8x496xf32>
    %68 = tpu.concatenate %66, %67 in 1 : vector<8x16xf32>, vector<8x496xf32> -> vector<8x512xf32>
    %69 = vector.extract_strided_slice %1 {offsets = [1, 0], sizes = [1, 512], strides = [1, 1]} : vector<9x512xf32> to vector<1x512xf32>
    %70 = vector.broadcast %69 : vector<1x512xf32> to vector<8x512xf32>
    %71 = arith.mulf %68, %70 : vector<8x512xf32>
    %72 = vector.extract_strided_slice %59 {offsets = [0, 497], sizes = [8, 15], strides = [1, 1]} : vector<8x512xf32> to vector<8x15xf32>
    %73 = vector.extract_strided_slice %59 {offsets = [0, 0], sizes = [8, 497], strides = [1, 1]} : vector<8x512xf32> to vector<8x497xf32>
    %74 = tpu.concatenate %72, %73 in 1 : vector<8x15xf32>, vector<8x497xf32> -> vector<8x512xf32>
    %75 = vector.extract_strided_slice %1 {offsets = [2, 0], sizes = [1, 512], strides = [1, 1]} : vector<9x512xf32> to vector<1x512xf32>
    %76 = vector.broadcast %75 : vector<1x512xf32> to vector<8x512xf32>
    %77 = arith.mulf %74, %76 : vector<8x512xf32>
    %78 = vector.extract_strided_slice %59 {offsets = [0, 511], sizes = [8, 1], strides = [1, 1]} : vector<8x512xf32> to vector<8x1xf32>
    %79 = vector.extract_strided_slice %59 {offsets = [0, 0], sizes = [8, 511], strides = [1, 1]} : vector<8x512xf32> to vector<8x511xf32>
    %80 = tpu.concatenate %78, %79 in 1 : vector<8x1xf32>, vector<8x511xf32> -> vector<8x512xf32>
    %81 = vector.extract_strided_slice %1 {offsets = [3, 0], sizes = [1, 512], strides = [1, 1]} : vector<9x512xf32> to vector<1x512xf32>
    %82 = vector.broadcast %81 : vector<1x512xf32> to vector<8x512xf32>
    %83 = arith.mulf %80, %82 : vector<8x512xf32>
    %84 = vector.extract_strided_slice %59 {offsets = [0, 1], sizes = [8, 511], strides = [1, 1]} : vector<8x512xf32> to vector<8x511xf32>
    %85 = vector.extract_strided_slice %59 {offsets = [0, 0], sizes = [8, 1], strides = [1, 1]} : vector<8x512xf32> to vector<8x1xf32>
    %86 = tpu.concatenate %84, %85 in 1 : vector<8x511xf32>, vector<8x1xf32> -> vector<8x512xf32>
    %87 = vector.extract_strided_slice %1 {offsets = [5, 0], sizes = [1, 512], strides = [1, 1]} : vector<9x512xf32> to vector<1x512xf32>
    %88 = vector.broadcast %87 : vector<1x512xf32> to vector<8x512xf32>
    %89 = arith.mulf %86, %88 : vector<8x512xf32>
    %90 = vector.extract_strided_slice %59 {offsets = [0, 15], sizes = [8, 497], strides = [1, 1]} : vector<8x512xf32> to vector<8x497xf32>
    %91 = vector.extract_strided_slice %59 {offsets = [0, 0], sizes = [8, 15], strides = [1, 1]} : vector<8x512xf32> to vector<8x15xf32>
    %92 = tpu.concatenate %90, %91 in 1 : vector<8x497xf32>, vector<8x15xf32> -> vector<8x512xf32>
    %93 = vector.extract_strided_slice %1 {offsets = [6, 0], sizes = [1, 512], strides = [1, 1]} : vector<9x512xf32> to vector<1x512xf32>
    %94 = vector.broadcast %93 : vector<1x512xf32> to vector<8x512xf32>
    %95 = arith.mulf %92, %94 : vector<8x512xf32>
    %96 = vector.extract_strided_slice %59 {offsets = [0, 16], sizes = [8, 496], strides = [1, 1]} : vector<8x512xf32> to vector<8x496xf32>
    %97 = vector.extract_strided_slice %59 {offsets = [0, 0], sizes = [8, 16], strides = [1, 1]} : vector<8x512xf32> to vector<8x16xf32>
    %98 = tpu.concatenate %96, %97 in 1 : vector<8x496xf32>, vector<8x16xf32> -> vector<8x512xf32>
    %99 = vector.extract_strided_slice %1 {offsets = [7, 0], sizes = [1, 512], strides = [1, 1]} : vector<9x512xf32> to vector<1x512xf32>
    %100 = vector.broadcast %99 : vector<1x512xf32> to vector<8x512xf32>
    %101 = arith.mulf %98, %100 : vector<8x512xf32>
    %102 = vector.extract_strided_slice %59 {offsets = [0, 17], sizes = [8, 495], strides = [1, 1]} : vector<8x512xf32> to vector<8x495xf32>
    %103 = vector.extract_strided_slice %59 {offsets = [0, 0], sizes = [8, 17], strides = [1, 1]} : vector<8x512xf32> to vector<8x17xf32>
    %104 = tpu.concatenate %102, %103 in 1 : vector<8x495xf32>, vector<8x17xf32> -> vector<8x512xf32>
    %105 = vector.extract_strided_slice %1 {offsets = [8, 0], sizes = [1, 512], strides = [1, 1]} : vector<9x512xf32> to vector<1x512xf32>
    %106 = vector.broadcast %105 : vector<1x512xf32> to vector<8x512xf32>
    %107 = arith.mulf %104, %106 : vector<8x512xf32>
    %108 = tpu.concatenate %65, %71, %77, %83, %59, %89, %95, %101, %107, %0 in 0 : vector<8x512xf32>, vector<8x512xf32>, vector<8x512xf32>, vector<8x512xf32>, vector<8x512xf32>, vector<8x512xf32>, vector<8x512xf32>, vector<8x512xf32>, vector<8x512xf32>, vector<4x512xf32> -> vector<76x512xf32>
    %109 = arith.truncf %108 : vector<76x512xf32> to vector<76x512xbf16>
    %c0_8 = arith.constant 0 : index
    %c0_9 = arith.constant 0 : index
    %110 = vector.load %arg4[%c0_8, %c0_9] : memref<8x76xf32, #tpu.memory_space<vmem>>, vector<8x76xf32>
    %111 = arith.truncf %110 : vector<8x76xf32> to vector<8x76xbf16>
    %cst_10 = arith.constant dense<0.000000e+00> : vector<8x512xf32>
    %112 = tpu.matmul %111, %109, %cst_10 {dimension_numbers = #tpu.dot_dimension_numbers<[1], [0], [0], [1], [0, 0, 1, 1], [], []>} : vector<8x76xbf16>, vector<76x512xbf16>, vector<8x512xf32> -> vector<8x512xf32>
    %c0_11 = arith.constant 0 : index
    %c0_12 = arith.constant 0 : index
    %113 = vector.load %arg5[%c0_11, %c0_12] : memref<8x1xf32, #tpu.memory_space<vmem>>, vector<8x1xf32>
    %114 = vector.broadcast %113 : vector<8x1xf32> to vector<8x512xf32>
    %115 = arith.addf %112, %114 : vector<8x512xf32>
    %116 = arith.truncf %115 : vector<8x512xf32> to vector<8x512xbf16>
    %c0_13 = arith.constant 0 : index
    %c0_14 = arith.constant 0 : index
    %117 = vector.load %arg7[%c0_13, %c0_14] : memref<512x128xbf16, #tpu.memory_space<vmem>>, vector<512x128xbf16>
    %cst_15 = arith.constant dense<0.000000e+00> : vector<8x128xf32>
    %118 = tpu.matmul %116, %117, %cst_15 {dimension_numbers = #tpu.dot_dimension_numbers<[1], [0], [0], [1], [0, 0, 1, 1], [], []>} : vector<8x512xbf16>, vector<512x128xbf16>, vector<8x128xf32> -> vector<8x128xf32>
    %c0_16 = arith.constant 0 : index
    %c0_17 = arith.constant 0 : index
    %119 = vector.load %arg8[%c0_16, %c0_17] : memref<8x128xf32, #tpu.memory_space<vmem>>, vector<8x128xf32>
    tpu.vector_store %arg8[%c0_16, %c0_17], %118 {strides = array<i32>} : memref<8x128xf32, #tpu.memory_space<vmem>>, vector<8x128xf32>,
    return
  }
  func.func @transform_0(%arg0: i32) -> (i32, i32) {
    %c0_i32 = arith.constant 0 : i32
    %c0_i32_0 = arith.constant 0 : i32
    %c0_i32_1 = arith.constant 0 : i32
    return %c0_i32, %c0_i32_0 : i32, i32
  }
  func.func @transform_1(%arg0: i32) -> (i32, i32) {
    %c0_i32 = arith.constant 0 : i32
    %c0_i32_0 = arith.constant 0 : i32
    %c0_i32_1 = arith.constant 0 : i32
    return %c0_i32, %c0_i32_0 : i32, i32
  }
  func.func @transform_2(%arg0: i32) -> (i32, i32) {
    %c0_i32 = arith.constant 0 : i32
    %c0_i32_0 = arith.constant 0 : i32
    %c0_i32_1 = arith.constant 0 : i32
    return %c0_i32, %c0_i32_0 : i32, i32
  }
  func.func @transform_3(%arg0: i32) -> (i32, i32) {
    %c0_i32 = arith.constant 0 : i32
    %c0_i32_0 = arith.constant 0 : i32
    %c0_i32_1 = arith.constant 0 : i32
    return %c0_i32, %c0_i32_0 : i32, i32
  }
  func.func @transform_4(%arg0: i32) -> (i32, i32) {
    %c0_i32 = arith.constant 0 : i32
    %c0_i32_0 = arith.constant 0 : i32
    %c0_i32_1 = arith.constant 0 : i32
    return %c0_i32, %c0_i32_0 : i32, i32
  }
  func.func @transform_5(%arg0: i32) -> (i32, i32) {
    %c0_i32 = arith.constant 0 : i32
    %c0_i32_0 = arith.constant 0 : i32
    %c0_i32_1 = arith.constant 0 : i32
    return %c0_i32, %c0_i32_0 : i32, i32
  }
  func.func @transform_6(%arg0: i32) -> (i32, i32) {
    %c0_i32 = arith.constant 0 : i32
    %c0_i32_0 = arith.constant 0 : i32
    %c0_i32_1 = arith.constant 0 : i32
    return %c0_i32, %c0_i32_0 : i32, i32
  }
  func.func @transform_7(%arg0: i32) -> (i32, i32) {
    %c0_i32 = arith.constant 0 : i32
    %c0_i32_0 = arith.constant 0 : i32
    %c0_i32_1 = arith.constant 0 : i32
    return %c0_i32, %c0_i32_0 : i32, i32
  }
}

</mosaic_0001>

<bundles_post_ra>
// kernel: optimized_block_forward.1
= control target key start
LH: loop header
LB: loop body
LE: loop exit
PB: predicated region body
PF: predicated region fallthrough
CT: control target
= control target key end

     0   :  { %s1284_s28 = smov 17   ;;  %s1285_s29 = smov 16   ;;  %vm59_vm0 = vcmask 138240   ;;  %vm96_vm1 = vcmask 130048   ;;  %vm394_vm2 = vcmask 1043456   ;;  %vm133_vm3 = vcmask 121856   ;;  %s2051_s0 = inlined_call_operand.vmem [shape: f32[4,512], index: 0, kind: input, shape index: {}]   ;;  %s2052_s5 = inlined_call_operand.vmem [shape: f32[9,512], index: 5, kind: input, shape index: {}]   ;;  %s2053_s1 = inlined_call_operand.vmem [shape: f32[8,36], index: 1, kind: input, shape index: {}]   ;;  %s2054_s2 = inlined_call_operand.vmem [shape: f32[8,1], index: 2, kind: input, shape index: {}]   ;;  %s2055_s4 = inlined_call_operand.vmem [shape: f32[8,1], index: 4, kind: input, shape index: {}]   ;;  %s2056_s3 = inlined_call_operand.vmem [shape: f32[8,76], index: 3, kind: input, shape index: {}]   ;;  %s2057_s6 = inlined_call_operand.vmem [shape: bf16[512,128], index: 6, kind: input, shape index: {}]   ;;  %s2058_s7 = inlined_call_operand.vmem [shape: f32[8,128], index: 7, kind: output, shape index: {}]  }
   0x1   :  { %v1336_v0 = vld [vmem:[%s2051_s0 + $0x8] sm:$0xff]  ;;  %v1343_v1 = vld [vmem:[%s2051_s0] sm:$0xff]  ;;  %s1286_s0 = smov 15   ;;  %s1287_s30 = smov 1   ;;  %v1421_v46 = vld [vmem:[%s2052_s5 + $0x18] sm:$0xff]  ;;  %vm170_vm4 = vcmask 7168  }
   0x2   :  { %46 = vst [vmem:[#allocation1 + $0x10] ss:$2 sm:$0xff] %v1336_v0  ;;  %s1288_s8 = smov 127   ;;  %s1289_s9 = smov 113   ;;  %v71_v48 = vperm.slane %v1421_v46, 0  ;;  %v108_v49 = vperm.slane %v1421_v46, 1 }
   0x3   :  { %38 = vst [vmem:[#allocation1] ss:$2 sm:$0xff] %v1336_v0  ;;  %s1290_s10 = smov 112   ;;  %s1291_s11 = smov 111   ;;  %v145_v61 = vperm.slane %v1421_v46, 2  ;;  %v182_v62 = vperm.slane %v1421_v46, 3 }
   0x4   :  { %vm202_vm5 = vcmask 1039360   ;;  %vm276_vm6 = vcmask 916480   ;;  %vm239_vm7 = vcmask 924672   ;;  %vm313_vm8 = vcmask 908288  }
   0x5   :  { %vm435_vm9 = vcmask 1041408   ;;  %vm431_vm10 = vcmask 293888   ;;  %vm719_vm11 = vcmask 1045504   ;;  %vm715_vm12 = vcmask 621568  }
   0x9   :  { %v50_v2 = vld.sshfl [vmem:[#allocation1 + $0x18] sm:$0xff pattern:$0x75316420]  ;;  %v49_v3 = vld.sshfl [vmem:[#allocation1 + $0x10] sm:$0xff pattern:$0x75316420] }
   0xa   :  { %57 = vrot.lane.b32.xlu1 %v50_v2, %s1284_s28  ;;  %55 = vrot.lane.b32.xlu0 %v49_v3, %s1284_s28  ;;  %83 = vst [vmem:[#allocation1 + $0x10] ss:$2 sm:$0xff] %v1336_v0  ;;  %v1348_v4 = vld.sshfl [vmem:[#allocation1 + $0x8] sm:$0xff pattern:$0x75316420] }
   0xb   :  { %44 = vst [vmem:[#allocation1] ss:$2 sm:$0xff] %v1343_v1 }
  0x11   :  { %v86_v5 = vld.sshfl [vmem:[#allocation1 + $0x10] sm:$0xff pattern:$0x75316420]  ;;  %v87_v6 = vld.sshfl [vmem:[#allocation1 + $0x18] sm:$0xff pattern:$0x75316420] }
  0x12   :  { %92 = vrot.lane.b32.xlu1 %v86_v5, %s1285_s29  ;;  %120 = vst [vmem:[#allocation1 + $0x10] ss:$2 sm:$0xff] %v1336_v0  ;;  %94 = vrot.lane.b32.xlu2 %v87_v6, %s1285_s29  ;;  %v1354_v7 = vld.sshfl [vmem:[#allocation1] sm:$0xff pattern:$0x75316420] }
  0x13   :  { %v48_v8 = vld.sshfl [vmem:[#allocation1 + $0x8] sm:$0xff pattern:$0x75316420] }
  0x14   :  { %76 = vst [vmem:[#allocation1] ss:$2 sm:$0xff] %v1336_v0 }
  0x19   :  { %v123_v9 = vld.sshfl [vmem:[#allocation1 + $0x10] sm:$0xff pattern:$0x75316420]  ;;  %v124_v10 = vld.sshfl [vmem:[#allocation1 + $0x18] sm:$0xff pattern:$0x75316420] }
  0x1a   :  { %129 = vrot.lane.b32.xlu0 %v123_v9, %s1286_s0  ;;  %131 = vrot.lane.b32.xlu1 %v124_v10, %s1286_s0  ;;  %157 = vst [vmem:[#allocation1 + $0x10] ss:$2 sm:$0xff] %v1336_v0 }
  0x1b   :  { %v77_v11 = vld.sshfl [vmem:[#allocation1 + $0x8] sm:$0xff pattern:$0x75316420]  ;;  %53 = vrot.lane.b32.xlu2 %v48_v8, %s1284_s28 }
  0x1c   :  { %81 = vst [vmem:[#allocation1] ss:$2 sm:$0xff] %v1343_v1 }
  0x21   :  { %v160_v12 = vld.sshfl [vmem:[#allocation1 + $0x10] sm:$0xff pattern:$0x75316420]  ;;  %v161_v13 = vld.sshfl [vmem:[#allocation1 + $0x18] sm:$0xff pattern:$0x75316420] }
  0x22   :  { %166 = vrot.lane.b32.xlu1 %v160_v12, %s1287_s30  ;;  %189 = vst [vmem:[#allocation1 + $0x10] ss:$2 sm:$0xff] %v1336_v0 }
  0x23   :  { %v85_v14 = vld.sshfl [vmem:[#allocation1 + $0x8] sm:$0xff pattern:$0x75316420]  ;;  %v84_v15 = vld.sshfl [vmem:[#allocation1] sm:$0xff pattern:$0x75316420]  ;;  %78 = vrot.lane.b32.xlu2 %v77_v11, %s1285_s29 }
  0x24   :  { %90 = vrot.lane.b32.xlu0 %v85_v14, %s1285_s29  ;;  %113 = vst [vmem:[#allocation1] ss:$2 sm:$0xff] %v1336_v0 }
  0x29   :  { %v192_v16 = vld.sshfl [vmem:[#allocation1 + $0x10] sm:$0xff pattern:$0x75316420]  ;;  %v193_v17 = vld.sshfl [vmem:[#allocation1 + $0x18] sm:$0xff pattern:$0x75316420] }
  0x2a   :  { %226 = vst [vmem:[#allocation1 + $0x10] ss:$2 sm:$0xff] %v1336_v0  ;;  %198 = vrot.lane.b32.xlu1 %v192_v16, %s1288_s8 }
  0x2b   :  { %168 = vrot.lane.b32.xlu2 %v161_v13, %s1287_s30  ;;  %v1370_v18 = vld.sshfl [vmem:[#allocation1 + $0x8] sm:$0xff pattern:$0x75316420] }
  0x2c   :  { %88 = vrot.lane.b32.xlu0 %v84_v15, %s1285_s29  ;;  %118 = vst [vmem:[#allocation1] ss:$2 sm:$0xff] %v1343_v1 }
  0x31   :  { %v229_v19 = vld.sshfl [vmem:[#allocation1 + $0x10] sm:$0xff pattern:$0x75316420]  ;;  %v230_v20 = vld.sshfl [vmem:[#allocation1 + $0x18] sm:$0xff pattern:$0x75316420] }
  0x32   :  { %263 = vst [vmem:[#allocation1 + $0x10] ss:$2 sm:$0xff] %v1336_v0  ;;  %237 = vrot.lane.b32.xlu1 %v230_v20, %s1289_s9 }
  0x33   :  { %200 = vrot.lane.b32.xlu2 %v193_v17, %s1288_s8  ;;  %v122_v21 = vld.sshfl [vmem:[#allocation1 + $0x8] sm:$0xff pattern:$0x75316420]  ;;  %v1377_v22 = vld.sshfl [vmem:[#allocation1] sm:$0xff pattern:$0x75316420] }
  0x34   :  { %235 = vrot.lane.b32.xlu0 %v229_v19, %s1289_s9  ;;  %150 = vst [vmem:[#allocation1] ss:$2 sm:$0xff] %v1336_v0 }
  0x39   :  { %v266_v23 = vld.sshfl [vmem:[#allocation1 + $0x10] sm:$0xff pattern:$0x75316420]  ;;  %v267_v24 = vld.sshfl [vmem:[#allocation1 + $0x18] sm:$0xff pattern:$0x75316420] }
  0x3a   :  { %300 = vst [vmem:[#allocation1 + $0x10] ss:$2 sm:$0xff] %v1336_v0  ;;  %274 = vrot.lane.b32.xlu1 %v267_v24, %s1290_s10  ;;  %v1492_v24 = vld [vmem:[%s2052_s5 + $0x10] sm:$0xff] }
  0x3b   :  { %127 = vrot.lane.b32.xlu2 %v122_v21, %s1286_s0  ;;  %v1384_v25 = vld.sshfl [vmem:[#allocation1 + $0x8] sm:$0xff pattern:$0x75316420] }
  0x3c   :  { %272 = vrot.lane.b32.xlu0 %v266_v23, %s1290_s10  ;;  %155 = vst [vmem:[#allocation1] ss:$2 sm:$0xff] %v1343_v1 }
  0x41   :  { %v303_v26 = vld.sshfl [vmem:[#allocation1 + $0x10] sm:$0xff pattern:$0x75316420]  ;;  %v304_v27 = vld.sshfl [vmem:[#allocation1 + $0x18] sm:$0xff pattern:$0x75316420] }
  0x42   :  { %361 = vst [vmem:[#allocation1 + $0x10] ss:$2 sm:$0xff] %v1336_v0 }
  0x43   :  { %v159_v28 = vld.sshfl [vmem:[#allocation1 + $0x8] sm:$0xff pattern:$0x75316420]  ;;  %v158_v29 = vld.sshfl [vmem:[#allocation1] sm:$0xff pattern:$0x75316420] }
  0x44   :  { %309 = vrot.lane.b32.xlu0 %v303_v26, %s1291_s11  ;;  %187 = vst [vmem:[#allocation1] ss:$2 sm:$0xff] %v1343_v1  ;;  %v292_v26 = vperm.slane %v1492_v24, 7 }
  0x49   :  { %v364_v19 = vld.sshfl [vmem:[#allocation1 + $0x10] sm:$0xff pattern:$0x75316420]  ;;  %v1482_v20 = vld.sshfl [vmem:[#allocation1 + $0x18] sm:$0xff pattern:$0x75316420] }
  0x4a   :  { %678 = vst [vmem:[#allocation1 + $0x10] ss:$2 sm:$0xff] %v1336_v0 }
  0x4b   :  { %v190_v30 = vld.sshfl [vmem:[#allocation1] sm:$0xff pattern:$0x75316420]  ;;  %v191_v31 = vld.sshfl [vmem:[#allocation1 + $0x8] sm:$0xff pattern:$0x75316420] }
  0x4c   :  { %311 = vrot.lane.b32.xlu0 %v304_v27, %s1291_s11  ;;  %194 = vrot.lane.b32.xlu2 %v190_v30, %s1288_s8  ;;  %210 = vst [vmem:[#allocation1] ss:$2 sm:$0xff] %v1343_v1 }
  0x53   :  { %v211_v32 = vld.sshfl [vmem:[#allocation1] sm:$0xff pattern:$0x75316420] }
  0x54   :  { %164 = vrot.lane.b32.xlu0 %v159_v28, %s1287_s30  ;;  %212 = vrot.lane.b32.xlu2 %v211_v32, %s1288_s8  ;;  %224 = vst [vmem:[#allocation1] ss:$2 sm:$0xff] %v1343_v1 }
  0x5b   :  { %v228_v33 = vld.sshfl [vmem:[#allocation1 + $0x8] sm:$0xff pattern:$0x75316420]  ;;  %v227_v34 = vld.sshfl [vmem:[#allocation1] sm:$0xff pattern:$0x75316420] }
  0x5c   :  { %196 = vrot.lane.b32.xlu0 %v191_v31, %s1288_s8  ;;  %233 = vrot.lane.b32.xlu1 %v228_v33, %s1289_s9  ;;  %247 = vst [vmem:[#allocation1] ss:$2 sm:$0xff] %v1343_v1  ;;  %v1509_v31 = vld [vmem:[%s2052_s5 + $0x30] ss:$0 sm:$0xff] }
  0x63   :  { %v248_v35 = vld.sshfl [vmem:[#allocation1] sm:$0xff pattern:$0x75316420] }
  0x64   :  { %249 = vrot.lane.b32.xlu2 %v248_v35, %s1289_s9  ;;  %261 = vst [vmem:[#allocation1] ss:$2 sm:$0xff] %v1343_v1  ;;  %231 = vrot.lane.b32.xlu0 %v227_v34, %s1289_s9  ;;  %v107_v35 = vperm.slane %v1492_v24, 1 }
  0x6b   :  { %v265_v36 = vld.sshfl [vmem:[#allocation1 + $0x8] sm:$0xff pattern:$0x75316420]  ;;  %v264_v37 = vld.sshfl [vmem:[#allocation1] sm:$0xff pattern:$0x75316420] }
  0x6c   :  { %270 = vrot.lane.b32.xlu2 %v265_v36, %s1290_s10  ;;  %268 = vrot.lane.b32.xlu1 %v264_v37, %s1290_s10  ;;  %284 = vst [vmem:[#allocation1] ss:$2 sm:$0xff] %v1343_v1  ;;  %v95_v38 = vpop.permute.xlu2 %94 }
  0x73   :  { %v285_v39 = vld.sshfl [vmem:[#allocation1] sm:$0xff pattern:$0x75316420] }
  0x74   :  { %286 = vrot.lane.b32.xlu2 %v285_v39, %s1290_s10  ;;  %298 = vst [vmem:[#allocation1] ss:$2 sm:$0xff] %v1343_v1 }
  0x75   :  { %v1408_v40 = vpop.permute.xlu2 %53 }
  0x7b   :  { %v302_v41 = vld.sshfl [vmem:[#allocation1 + $0x8] sm:$0xff pattern:$0x75316420]  ;;  %v301_v42 = vld.sshfl [vmem:[#allocation1] sm:$0xff pattern:$0x75316420] }
  0x7c   :  { %307 = vrot.lane.b32.xlu1 %v302_v41, %s1291_s11  ;;  %305 = vrot.lane.b32.xlu0 %v301_v42, %s1291_s11  ;;  %321 = vst [vmem:[#allocation1] ss:$2 sm:$0xff] %v1343_v1  ;;  %v58_v43 = vpop.permute.xlu1 %57  ;;  %v1413_v44 = vpop.permute.xlu0 %55 }
  0x7d   :  { %162 = vrot.lane.b32.xlu2 %v158_v29, %s1287_s30  ;;  %v62_v45 = vsel %vm59_vm0, %v1413_v44, %v58_v43  ;;  %v79_v47 = vpop.permute.xlu2 %78  ;;  %v255_v29 = vperm.slane %v1492_v24, 6  ;;  %v70_v43 = vperm.slane %v1492_v24, 0 }
  0x7e   :  { %v75_v53 = vmul.f32 %v71_v48, %v62_v45 }
  0x83   :  { %v322_v50 = vld.sshfl [vmem:[#allocation1] sm:$0xff pattern:$0x75316420] }
  0x84   :  { %40 = vrot.lane.b32.xlu0 %v1348_v4, %s1284_s28  ;;  %323 = vrot.lane.b32.xlu1 %v322_v50, %s1291_s11  ;;  %359 = vst [vmem:[#allocation1] ss:$2 sm:$0xff] %v1343_v1  ;;  %v93_v51 = vpop.permute.xlu1 %92 }
  0x85   :  { %v99_v52 = vsel %vm96_vm1, %v93_v51, %v95_v38  ;;  %115 = vrot.lane.b32.xlu2 %v1370_v18, %s1286_s0  ;;  %v169_v57 = vpop.permute.xlu2 %168 }
  0x86   :  { %v112_v54 = vmul.f32 %v108_v49, %v99_v52 }
  0x88   :  { %v342_v55 = vrot.slane %v112_v54, 4  ;;  %v181_v54 = vperm.slane %v1492_v24, 3 }
  0x8a   :  { %v1437_v56 = vsel %vm394_vm2, %v75_v53, %v342_v55 }
  0x8b   :  { %v363_v50 = vld.sshfl [vmem:[#allocation1 + $0x8] sm:$0xff pattern:$0x75316420] }
  0x8c   :  { %125 = vrot.lane.b32.xlu0 %v1377_v22, %s1286_s0  ;;  %152 = vrot.lane.b32.xlu1 %v1384_v25, %s1287_s30  ;;  %v1443_v58 = vpop.permute.xlu0 %129  ;;  %v132_v59 = vpop.permute.xlu1 %131  ;;  %v218_v25 = vperm.slane %v1492_v24, 5 }
  0x8d   :  { %v136_v60 = vsel %vm133_vm3, %v1443_v58, %v132_v59  ;;  %v1459_v6 = vpop.permute.xlu2 %200 }
  0x8e   :  { %v149_v3 = vmul.f32 %v145_v61, %v136_v60  ;;  %v144_v60 = vperm.slane %v1492_v24, 2  ;;  %v1260_v24 = vld [vmem:[%s2057_s6 + $0xb8] sm:$0xff] }
  0x94   :  { %51 = vrot.lane.b32.xlu1 %v1354_v7, %s1284_s28  ;;  %v1451_v63 = vpop.permute.xlu1 %166 }
  0x95   :  { %v173_v2 = vsel %vm170_vm4, %v1451_v63, %v169_v57  ;;  %v1472_v13 = vpop.permute.xlu2 %127 }
  0x96   :  { %v91_v4 = vpop.permute.xlu0 %90  ;;  %v186_v5 = vmul.f32 %v182_v62, %v173_v2 }
  0x97   :  { %v98_v36 = vsel %vm96_vm1, %v91_v4, %v93_v51  ;;  %v61_v51 = vsel %vm59_vm0, %v1408_v40, %v1413_v44 }
  0x98   :  { %v354_v8 = vrot.slane %v186_v5, 4  ;;  %v111_v52 = vmul.f32 %v107_v35, %v98_v36  ;;  %v74_v59 = vmul.f32 %v70_v43, %v61_v51 }
  0x9a   :  { %v1462_v9 = vsel %vm394_vm2, %v149_v3, %v354_v8  ;;  %v341_v3 = vrot.slane %v111_v52, 4 }
  0x9b   :  { %v414_v7 = vpack.c.bf16 %v1462_v9, %v1437_v56 }
  0x9c   :  { %v1474_v14 = vpop.permute.xlu1 %198 }
  0x9d   :  { %v205_v0 = vsel %vm202_vm5, %v1474_v14, %v1459_v6 }
  0x9e   :  { %v89_v10 = vpop.permute.xlu0 %88  ;;  %v222_v28 = vmul.f32 %v218_v25, %v205_v0  ;;  %v219_v0 = vperm.slane %v1421_v46, 5 }
  0x9f   :  { %v1467_v11 = vsel %vm96_vm1, %v89_v10, %v91_v4  ;;  %v1470_v12 = vsel %vm96_vm1, %v79_v47, %v89_v10  ;;  %v1525_v47 = vld.sshfl [vmem:[#allocation1] sm:$0xff pattern:$0x75316420]  ;;  %v135_v4 = vsel %vm133_vm3, %v1472_v13, %v1443_v58 }
  0xa0   :  { %v376_v38 = vrot.slane %v222_v28, 4  ;;  %676 = vst [vmem:[#allocation1] ss:$2 sm:$0xff] %v1343_v1  ;;  %v1545_v1 = vld [vmem:[%s2052_s5 + $0x8] sm:$0xff]  ;;  %v148_v28 = vmul.f32 %v144_v60, %v135_v4 }
  0xa2   :  { %v405_v55 = vsel %vm394_vm2, %v364_v19, %v376_v38  ;;  %v291_v19 = vperm.slane %v1545_v1, 7 }
  0xa4   :  { %v1480_v17 = vpop.permute.xlu1 %237 }
  0xa6   :  { %v1476_v15 = vpop.permute.xlu0 %235  ;;  %v1478_v16 = vpop.permute.xlu2 %194 }
  0xa7   :  { %v242_v32 = vsel %vm239_vm7, %v1476_v15, %v1480_v17 }
  0xa8   :  { %v259_v39 = vmul.f32 %v255_v29, %v242_v32  ;;  %v423_v32 = vld [vmem:[%s2053_s1] sm:$0xff] }
  0xa9   :  { %v1575_v51 = vpack.c.bf16 %v423_v32, %v423_v32  ;;  %v1292_v32 = vmov 0  }
  0xaa   :  { %1278 = vset.pattern.permute.xlu1 %v1292_v32  ;;  %1279 = vset.pattern.permute.xlu0 %v1292_v32 }
  0xac   :  { %v1487_v23 = vpop.permute.xlu1 %274 }
  0xae   :  { %v273_v18 = vpop.permute.xlu0 %272  ;;  %v213_v21 = vpop.permute.xlu2 %212 }
  0xaf   :  { %v279_v27 = vsel %vm276_vm6, %v273_v18, %v1487_v23  ;;  %v215_v58 = vsel %vm202_vm5, %v1459_v6, %v213_v21  ;;  %v293_v6 = vperm.slane %v1421_v46, 7 }
  0xb0   :  { %v296_v30 = vmul.f32 %v292_v26, %v279_v27 }
  0xb2   :  { %v388_v41 = vrot.slane %v296_v30, 4 }
  0xb4   :  { %v409_v57 = vsel %vm394_vm2, %v259_v39, %v388_v41  ;;  %v223_v39 = vmul.f32 %v219_v0, %v215_v58  ;;  %v256_v41 = vperm.slane %v1421_v46, 6  ;;  %v1268_v46 = vld [vmem:[%s2057_s6 + $0xf8] sm:$0xff] }
  0xb5   :  { %v417_v8 = vpack.c.bf16 %v409_v57, %v405_v55 }
  0xb6   :  { %v1485_v22 = vpop.permute.xlu0 %309 }
  0xbe   :  { %v1514_v33 = vpop.permute.xlu0 %311  ;;  %v250_v34 = vpop.permute.xlu2 %249 }
  0xbf   :  { %v316_v37 = vsel %vm313_vm8, %v1485_v22, %v1514_v33  ;;  %v252_v52 = vsel %vm239_vm7, %v1480_v17, %v250_v34  ;;  %v377_v17 = vrot.slane %v223_v39, 4 }
  0xc0   :  { %v333_v42 = vmul.f32 %v1509_v31, %v316_v37  ;;  %v217_v37 = vperm.slane %v1545_v1, 5 }
  0xc2   :  { %v421_v45 = vpack.c.bf16 %v333_v42, %v333_v42 }
  0xc4   :  { %v443_v53 = vsel %vm435_vm9, %v421_v45, 0 }
  0xc5   :  { %479 = vmatpush.bf16.msra.mxu2 %v443_v53 }
  0xc6   :  { %v1540_v44 = vpop.permute.xlu0 %164  ;;  %v271_v2 = vpop.permute.xlu2 %270 }
  0xc7   :  { %v172_v5 = vsel %vm170_vm4, %v1540_v44, %v1451_v63  ;;  %v278_v27 = vsel %vm276_vm6, %v271_v2, %v273_v18  ;;  %v397_v63 = vsel %vm394_vm2, %v74_v59, %v341_v3  ;;  %v254_v18 = vperm.slane %v1545_v1, 6 }
  0xc8   :  { %v185_v10 = vmul.f32 %v181_v54, %v172_v5  ;;  %v295_v36 = vmul.f32 %v291_v19, %v278_v27 }
  0xc9   :  { %480 = vmatpush.bf16.msra.mxu2 %v417_v8  ;;  %v260_v8 = vmul.f32 %v256_v41, %v252_v52 }
  0xca   :  { %v353_v30 = vrot.slane %v185_v10, 4  ;;  %v387_v59 = vrot.slane %v295_v36, 4 }
  0xcc   :  { %v401_v38 = vsel %vm394_vm2, %v148_v28, %v353_v30 }
  0xcd   :  { %v413_v21 = vpack.c.bf16 %v401_v38, %v397_v63  ;;  %v425_v63 = vld [vmem:[%s2054_s2] sm:$0xff] }
  0xce   :  { %v197_v42 = vpop.permute.xlu0 %196  ;;  %v234_v45 = vpop.permute.xlu1 %233  ;;  %428 = vperm.xlu1 %1278, %v425_v63  }
  0xcf   :  { %v204_v53 = vsel %vm202_vm5, %v197_v42, %v1474_v14  ;;  %v241_v55 = vsel %vm239_vm7, %v234_v45, %v1476_v15  ;;  %v287_v57 = vpop.permute.xlu2 %286  ;;  %481 = vmatpush.bf16.msra.mxu2 %v413_v21  ;;  %v203_v52 = vsel %vm202_vm5, %v1478_v16, %v197_v42 }
  0xd0   :  { %v221_v3 = vmul.f32 %v217_v37, %v204_v53  ;;  %v258_v4 = vmul.f32 %v254_v18, %v241_v55  ;;  %v289_v5 = vsel %vm276_vm6, %v1487_v23, %v287_v57  ;;  %v406_v23 = vsel %vm394_vm2, %v1482_v20, %v377_v17  ;;  %v1618_v55 = vld [vmem:[%s2052_s5 + $0x20] ss:$0 sm:$0xff]  ;;  %v1623_v57 = vld [vmem:[%s2052_s5 + $0x28] ss:$0 sm:$0xff] }
  0xd1   :  { %v297_v14 = vmul.f32 %v293_v6, %v289_v5 }
  0xd2   :  { %v375_v34 = vrot.slane %v221_v3, 4  ;;  %1103 = vmatmul.msk.bf16.vlgmr.msra.gmra.mxu2 %vm431_vm10, %v1575_v51  ;;  %v408_v15 = vsel %vm394_vm2, %v258_v4, %v387_v59 }
  0xd3   :  { %v389_v10 = vrot.slane %v297_v14, 4 }
  0xd4   :  { %v404_v27 = vsel %vm394_vm2, %v363_v50, %v375_v34  ;;  %v1606_v50 = vld [vmem:[%s2052_s5] sm:$0xff] }
  0xd5   :  { %v416_v28 = vpack.c.bf16 %v408_v15, %v404_v27  ;;  %v410_v58 = vsel %vm394_vm2, %v260_v8, %v389_v10  ;;  %v290_v20 = vperm.slane %v1606_v50, 7  ;;  %v216_v21 = vperm.slane %v1606_v50, 5 }
  0xd6   :  { %v418_v30 = vpack.c.bf16 %v410_v58, %v406_v23  ;;  %v232_v36 = vpop.permute.xlu0 %231  ;;  %v253_v59 = vperm.slane %v1606_v50, 6 }
  0xd7   :  { %v240_v42 = vsel %vm239_vm7, %v232_v36, %v234_v45 }
  0xd8   :  { %v257_v8 = vmul.f32 %v253_v59, %v240_v42 }
  0xde   :  { %v269_v38 = vpop.permute.xlu1 %268 }
  0xdf   :  { %v277_v39 = vsel %vm276_vm6, %v269_v38, %v271_v2  ;;  %v220_v2 = vmul.f32 %v216_v21, %v203_v52  ;;  %v163_v52 = vpop.permute.xlu2 %162 }
  0xe0   :  { %v294_v53 = vmul.f32 %v290_v20, %v277_v39 }
  0xe1   :  { %v374_v15 = vrot.slane %v220_v2, 4 }
  0xe2   :  { %v386_v17 = vrot.slane %v294_v53, 4 }
  0xe3   :  { %v403_v36 = vsel %vm394_vm2, %v1525_v47, %v374_v15 }
  0xe4   :  { %v407_v58 = vsel %vm394_vm2, %v257_v8, %v386_v17  ;;  %v142_v8 = vperm.slane %v1606_v50, 2 }
  0xe5   :  { %v415_v39 = vpack.c.bf16 %v407_v58, %v403_v36  ;;  %v2059_v58 = vperm.slane %v1545_v1, 0 }
  0xee   :  { %v308_v3 = vpop.permute.xlu1 %307  ;;  %v306_v16 = vpop.permute.xlu0 %305 }
  0xef   :  { %v315_v4 = vsel %vm313_vm8, %v308_v3, %v1485_v22  ;;  %v314_v5 = vsel %vm313_vm8, %v306_v16, %v308_v3  ;;  %v1642_v22 = vld [vmem:[%s2052_s5 + $0x38] ss:$0 sm:$0xff]  ;;  %v179_v16 = vperm.slane %v1606_v50, 3 }
  0xf0   :  { %v331_v14 = vmul.f32 %v1618_v55, %v314_v5  ;;  %v332_v34 = vmul.f32 %v1623_v57, %v315_v4  ;;  %v2062_v4 = vperm.slane %v1606_v50, 1  ;;  %v2061_v5 = vperm.slane %v1545_v1, 1 }
  0xf2   :  { %v419_v10 = vpack.c.bf16 %v331_v14, %v331_v14  ;;  %v420_v27 = vpack.c.bf16 %v332_v34, %v332_v34  ;;  %v116_v14 = vpop.permute.xlu2 %115  ;;  %v143_v34 = vperm.slane %v1545_v1, 2 }
  0xf4   :  { %v437_v23 = vsel %vm435_vm9, %v419_v10, 0  ;;  %v440_v45 = vsel %vm435_vm9, %v420_v27, 0  ;;  %v109_v10 = vmul.f32 %v2062_v4, %v1470_v12 }
  0xf5   :  { %453 = vmatpush.bf16.msra.mxu0 %v437_v23  ;;  %466 = vmatpush.bf16.msra.mxu1 %v440_v45  ;;  %v2060_v45 = vperm.slane %v1606_v50, 0 }
  0xf6   :  { %v41_v63 = vpop.permute.xlu0 %40  ;;  %v324_v32 = vpop.permute.xlu1 %323 }
  0xf7   :  { %v326_v38 = vsel %vm313_vm8, %v1514_v33, %v324_v32  ;;  %v2063_v33 = vperm.slane %v1545_v1, 3 }
  0xf8   :  { %v334_v53 = vmul.f32 %v1642_v22, %v326_v38 }
  0xf9   :  { %454 = vmatpush.bf16.msra.mxu0 %v415_v39  ;;  %467 = vmatpush.bf16.msra.mxu1 %v416_v28  ;;  %v171_v28 = vsel %vm170_vm4, %v163_v52, %v1540_v44  ;;  %v110_v44 = vmul.f32 %v2061_v5, %v1467_v11  ;;  %v339_v11 = vrot.slane %v109_v10, 4 }
  0xfa   :  { %v422_v2 = vpack.c.bf16 %v334_v53, %v334_v53 }
  0xfc   :  { %v446_v3 = vsel %vm435_vm9, %v422_v2, 0 }
  0xfd   :  { %492 = vmatpush.bf16.msra.mxu3 %v446_v3 }
  0xfe   :  { %v153_v42 = vpop.permute.xlu1 %152  ;;  %v126_v17 = vpop.permute.xlu0 %125 }
  0xff   :  { %v178_v47 = vsel %vm170_vm4, %v153_v42, %v163_v52  ;;  %v134_v27 = vsel %vm133_vm3, %v126_v17, %v1472_v13  ;;  %v141_v23 = vsel %vm133_vm3, %v116_v14, %v126_v17  ;;  %v340_v52 = vrot.slane %v110_v44, 4 }
 0x100   :  { %v183_v15 = vmul.f32 %v179_v16, %v178_v47  ;;  %v147_v12 = vmul.f32 %v143_v34, %v134_v27  ;;  %v146_v32 = vmul.f32 %v142_v8, %v141_v23 }
 0x101   :  { %493 = vmatpush.bf16.msra.mxu3 %v418_v30  ;;  %v184_v30 = vmul.f32 %v2063_v33, %v171_v28 }
 0x102   :  { %v351_v13 = vrot.slane %v183_v15, 4 }
 0x103   :  { %v352_v53 = vrot.slane %v184_v30, 4 }
 0x104   :  { %v399_v2 = vsel %vm394_vm2, %v146_v32, %v351_v13 }
 0x105   :  { %494 = vmatpush.bf16.msra.mxu3 %v414_v7 }
 0x106   :  { %v52_v36 = vpop.permute.xlu1 %51 }
 0x107   :  { %v60_v38 = vsel %vm59_vm0, %v52_v36, %v1408_v40  ;;  %v67_v39 = vsel %vm59_vm0, %v41_v63, %v52_v36  ;;  %v400_v40 = vsel %vm394_vm2, %v147_v12, %v352_v53  ;;  %v709_v53 = vld [vmem:[%s2055_s4] sm:$0xff] }
 0x108   :  { %v72_v56 = vmul.f32 %v2060_v45, %v67_v39  ;;  %v73_v9 = vmul.f32 %v2059_v58, %v60_v38  ;;  %1104 = vmatmul.msk.bf16.vlgmr.msra.gmra.mxu3 %vm431_vm10, %v1575_v51 }
 0x10a   :  { %v395_v7 = vsel %vm394_vm2, %v72_v56, %v339_v11  ;;  %v396_v3 = vsel %vm394_vm2, %v73_v9, %v340_v52 }
 0x10b   :  { %v411_v63 = vpack.c.bf16 %v399_v2, %v395_v7  ;;  %v412_v42 = vpack.c.bf16 %v400_v40, %v396_v3 }
 0x10d   :  { %455 = vmatpush.bf16.msra.mxu0 %v411_v63  ;;  %468 = vmatpush.bf16.msra.mxu1 %v412_v42 }
 0x110   :  { %1101 = vmatmul.msk.bf16.vlgmr.msra.gmra.mxu0 %vm431_vm10, %v1575_v51  ;;  %1102 = vmatmul.msk.bf16.vlgmr.msra.gmra.mxu1 %vm431_vm10, %v1575_v51 }
 0x140   :  { %v429_v47 = vpop.permute.xlu1 %428 }
 0x155   :  { %v483_v17 = vpop.f32.mrf.mxu2 }
 0x156   :  { %v484_v14 = vadd.f32 %v483_v17, %v429_v47 }
 0x158   :  { %v1698_v28 = vmax.f32 %v484_v14, 0.0 }
 0x15a   :  { %659 = vrot.lane.b32.xlu0 %v1698_v28, %s1291_s11  ;;  %557 = vrot.lane.b32.xlu2 %v1698_v28, %s1286_s0 }
 0x15d   :  { %v485_v15 = vpop.f32.mrf.mxu2 }
 0x162   :  { %617 = vrot.lane.b32.xlu0 %v1698_v28, %s1289_s9  ;;  %578 = vrot.lane.b32.xlu2 %v1698_v28, %s1287_s30 }
 0x16a   :  { %638 = vrot.lane.b32.xlu0 %v1698_v28, %s1290_s10  ;;  %515 = vrot.lane.b32.xlu2 %v1698_v28, %s1284_s28 }
 0x172   :  { %596 = vrot.lane.b32.xlu0 %v1698_v28, %s1288_s8 }
 0x18b   :  { %v496_v51 = vpop.f32.mrf.mxu3 }
 0x18c   :  { %v497_v32 = vadd.f32 %v496_v51, %v429_v47 }
 0x18d   :  { %v457_v10 = vpop.f32.mrf.mxu0  ;;  %v470_v27 = vpop.f32.mrf.mxu1 }
 0x18e   :  { %v458_v23 = vadd.f32 %v457_v10, %v429_v47  ;;  %v471_v44 = vadd.f32 %v470_v27, %v429_v47  ;;  %v1724_v38 = vmax.f32 %v497_v32, 0.0 }
 0x190   :  { %v1714_v30 = vmax.f32 %v458_v23, 0.0  ;;  %v1716_v12 = vmax.f32 %v471_v44, 0.0  ;;  %v679_v23 = vld.sshfl [vmem:[#allocation1] sm:$0xff pattern:$0x75316420] }
 0x191   :  { %v680_v44 = vld.sshfl [vmem:[#allocation1 + $0x8] sm:$0xff pattern:$0x75316420] }
 0x192   :  { %615 = vrot.lane.b32.xlu0 %v1716_v12, %s1289_s9  ;;  %555 = vrot.lane.b32.xlu1 %v1716_v12, %s1286_s0 }
 0x193   :  { %655 = vrot.lane.b32.xlu2 %v1714_v30, %s1291_s11  ;;  %v498_v13 = vpop.f32.mrf.mxu3 }
 0x195   :  { %v472_v36 = vpop.f32.mrf.mxu1  ;;  %v459_v11 = vpop.f32.mrf.mxu0 }
 0x19a   :  { %550 = vrot.lane.b32.xlu0 %v1724_v38, %s1286_s0  ;;  %576 = vrot.lane.b32.xlu1 %v1716_v12, %s1287_s30 }
 0x19b   :  { %613 = vrot.lane.b32.xlu2 %v1714_v30, %s1289_s9 }
 0x1a2   :  { %571 = vrot.lane.b32.xlu0 %v1724_v38, %s1287_s30  ;;  %513 = vrot.lane.b32.xlu1 %v1716_v12, %s1284_s28 }
 0x1a3   :  { %634 = vrot.lane.b32.xlu2 %v1714_v30, %s1290_s10 }
 0x1aa   :  { %505 = vrot.lane.b32.xlu0 %v1724_v38, %s1284_s28  ;;  %534 = vrot.lane.b32.xlu1 %v1716_v12, %s1285_s29 }
 0x1ab   :  { %592 = vrot.lane.b32.xlu2 %v1714_v30, %s1288_s8 }
 0x1b2   :  { %529 = vrot.lane.b32.xlu0 %v1724_v38, %s1285_s29  ;;  %661 = vrot.lane.b32.xlu1 %v1724_v38, %s1291_s11 }
 0x1b3   :  { %657 = vrot.lane.b32.xlu2 %v1716_v12, %s1291_s11 }
 0x1b4   :  { %v1766_v39 = vpop.permute.xlu2 %557 }
 0x1ba   :  { %619 = vrot.lane.b32.xlu1 %v1724_v38, %s1289_s9  ;;  %553 = vrot.lane.b32.xlu0 %v1714_v30, %s1286_s0 }
 0x1bb   :  { %536 = vrot.lane.b32.xlu2 %v1698_v28, %s1285_s29 }
 0x1bc   :  { %v1770_v52 = vpop.permute.xlu2 %578 }
 0x1c2   :  { %640 = vrot.lane.b32.xlu1 %v1724_v38, %s1290_s10  ;;  %532 = vrot.lane.b32.xlu0 %v1714_v30, %s1285_s29 }
 0x1c3   :  { %594 = vrot.lane.b32.xlu2 %v1716_v12, %s1288_s8 }
 0x1c4   :  { %v1777_v56 = vpop.permute.xlu2 %515 }
 0x1ca   :  { %598 = vrot.lane.b32.xlu1 %v1724_v38, %s1288_s8 }
 0x1cb   :  { %511 = vrot.lane.b32.xlu2 %v1714_v30, %s1284_s28 }
 0x1cc   :  { %v660_v9 = vpop.permute.xlu0 %659 }
 0x1d2   :  { %636 = vrot.lane.b32.xlu1 %v1716_v12, %s1290_s10 }
 0x1d4   :  { %v1779_v2 = vpop.permute.xlu0 %617 }
 0x1da   :  { %574 = vrot.lane.b32.xlu1 %v1714_v30, %s1287_s30 }
 0x1dc   :  { %v1783_v40 = vpop.permute.xlu0 %638 }
 0x1e2   :  { %712 = vperm.xlu1 %1278, %v709_v53  }
 0x1e4   :  { %v1787_v42 = vpop.permute.xlu0 %596 }
 0x1ed   :  { %v656_v7 = vpop.permute.xlu2 %655 }
 0x1f5   :  { %v1781_v3 = vpop.permute.xlu2 %613 }
 0x1fd   :  { %v1785_v63 = vpop.permute.xlu2 %634 }
 0x204   :  { %v1789_v47 = vpop.permute.xlu1 %555  ;;  %v1795_v51 = vpop.permute.xlu0 %615 }
 0x205   :  { %v1791_v17 = vpop.permute.xlu2 %592 }
 0x20c   :  { %v1793_v14 = vpop.permute.xlu1 %576  ;;  %v1805_v5 = vpop.permute.xlu0 %550 }
 0x20d   :  { %v658_v15 = vpop.permute.xlu2 %657 }
 0x20e   :  { %v663_v10 = vsel %vm313_vm8, %v656_v7, %v658_v15  ;;  %v664_v27 = vsel %vm313_vm8, %v658_v15, %v660_v9 }
 0x20f   :  { %v672_v13 = vmul.f32 %v1618_v55, %v663_v10  ;;  %v673_v32 = vmul.f32 %v1623_v57, %v664_v27  ;;  %v681_v27 = vld.sshfl [vmem:[#allocation1 + $0x10] sm:$0xff pattern:$0x75316420] }
 0x211   :  { %v703_v36 = vpack.c.bf16 %v679_v23, %v672_v13  ;;  %v704_v11 = vpack.c.bf16 %v680_v44, %v673_v32  ;;  %v682_v23 = vld.sshfl [vmem:[#allocation1 + $0x18] sm:$0xff pattern:$0x75316420] }
 0x213   :  { %v721_v53 = vsel %vm719_vm11, %v703_v36, 0  ;;  %v724_v58 = vsel %vm719_vm11, %v704_v11, 0 }
 0x214   :  { %735 = vmatpush.bf16.msrb.mxu0 %v721_v53  ;;  %748 = vmatpush.bf16.msrb.mxu1 %v724_v58  ;;  %v1803_v45 = vpop.permute.xlu1 %513  ;;  %v1809_v4 = vpop.permute.xlu0 %571 }
 0x21c   :  { %v1807_v15 = vpop.permute.xlu1 %534  ;;  %v1817_v53 = vpop.permute.xlu0 %505 }
 0x224   :  { %v662_v55 = vpop.permute.xlu1 %661 }
 0x225   :  { %v665_v57 = vsel %vm313_vm8, %v660_v9, %v662_v55  ;;  %v671_v10 = vsel %vm313_vm8, %v662_v55, %v656_v7 }
 0x226   :  { %v674_v44 = vmul.f32 %v1509_v31, %v665_v57  ;;  %v675_v13 = vmul.f32 %v1642_v22, %v671_v10  ;;  %v1827_v57 = vpop.permute.xlu0 %529 }
 0x228   :  { %v705_v58 = vpack.c.bf16 %v681_v27, %v674_v44  ;;  %v706_v32 = vpack.c.bf16 %v682_v23, %v675_v13  ;;  %v537_v44 = vpop.permute.xlu2 %536 }
 0x22a   :  { %v727_v36 = vsel %vm719_vm11, %v705_v58, 0  ;;  %v730_v11 = vsel %vm719_vm11, %v706_v32, 0  ;;  %v581_v32 = vsel %vm170_vm4, %v1793_v14, %v1770_v52 }
 0x22b   :  { %761 = vmatpush.bf16.msrb.mxu2 %v727_v36  ;;  %774 = vmatpush.bf16.msrb.mxu3 %v730_v11 }
 0x22c   :  { %v620_v33 = vpop.permute.xlu1 %619 }
 0x22d   :  { %v623_v9 = vsel %vm239_vm7, %v1779_v2, %v620_v33  ;;  %v629_v7 = vsel %vm239_vm7, %v620_v33, %v1781_v3 }
 0x22e   :  { %v632_v10 = vmul.f32 %v623_v9, %v255_v29  ;;  %v633_v27 = vmul.f32 %v629_v7, %v256_v41  ;;  %v582_v29 = vsel %vm170_vm4, %v1770_v52, %v1809_v4  ;;  %v560_v41 = vsel %vm133_vm3, %v1789_v47, %v1766_v39 }
 0x22f   :  { %v561_v52 = vsel %vm133_vm3, %v1766_v39, %v1805_v5  ;;  %v590_v7 = vmul.f32 %v581_v32, %v181_v54  ;;  %v539_v39 = vsel %vm96_vm1, %v1807_v15, %v537_v44 }
 0x230   :  { %v570_v54 = vmul.f32 %v561_v52, %v145_v61  ;;  %v519_v61 = vsel %vm59_vm0, %v1777_v56, %v1817_v53 }
 0x234   :  { %v641_v31 = vpop.permute.xlu1 %640 }
 0x235   :  { %v644_v22 = vsel %vm276_vm6, %v1783_v40, %v641_v31  ;;  %v650_v55 = vsel %vm276_vm6, %v641_v31, %v1785_v63  ;;  %v621_v31 = vsel %vm239_vm7, %v1781_v3, %v1795_v51  ;;  %v540_v3 = vsel %vm96_vm1, %v537_v44, %v1827_v57 }
 0x236   :  { %v653_v23 = vmul.f32 %v644_v22, %v292_v26  ;;  %v654_v33 = vmul.f32 %v650_v55, %v293_v6  ;;  %v591_v22 = vmul.f32 %v582_v29, %v182_v62  ;;  %v554_v55 = vpop.permute.xlu0 %553  ;;  %v622_v62 = vsel %vm239_vm7, %v1795_v51, %v1779_v2 }
 0x237   :  { %v549_v51 = vmul.f32 %v540_v3, %v108_v49  ;;  %v1252_v3 = vld [vmem:[%s2057_s6 + $0x78] sm:$0xff] }
 0x238   :  { %v701_v13 = vpack.c.bf16 %v653_v23, %v632_v10  ;;  %v702_v58 = vpack.c.bf16 %v654_v33, %v633_v27  ;;  %v595_v27 = vpop.permute.xlu2 %594  ;;  %v548_v23 = vmul.f32 %v539_v39, %v107_v35  ;;  %v694_v2 = vpack.c.bf16 %v591_v22, %v570_v54  ;;  %v1244_v54 = vld [vmem:[%s2057_s6 + $0x38] sm:$0xff] }
 0x239   :  { %v600_v33 = vsel %vm202_vm5, %v1791_v17, %v595_v27  ;;  %v631_v35 = vmul.f32 %v622_v62, %v254_v18  ;;  %v2068_v39 = vperm.slane %v1545_v1, 0 }
 0x23a   :  { %762 = vmatpush.bf16.msrb.mxu2 %v701_v13  ;;  %775 = vmatpush.bf16.msrb.mxu3 %v702_v58  ;;  %v609_v18 = vmul.f32 %v600_v33, %v216_v21  ;;  %v559_v21 = vsel %vm133_vm3, %v554_v55, %v1789_v47  ;;  %v1259_v47 = vld [vmem:[%s2057_s6 + $0xb0] sm:$0xff]  ;;  %v1242_v33 = vld [vmem:[%s2057_s6 + $0x28] sm:$0xff] }
 0x23c   :  { %v599_v36 = vpop.permute.xlu1 %598 }
 0x23d   :  { %v602_v26 = vsel %vm202_vm5, %v1787_v42, %v599_v36  ;;  %v608_v6 = vsel %vm202_vm5, %v599_v36, %v1791_v17 }
 0x23e   :  { %v611_v11 = vmul.f32 %v602_v26, %v218_v25  ;;  %v612_v9 = vmul.f32 %v608_v6, %v219_v0  ;;  %v569_v0 = vmul.f32 %v560_v41, %v144_v60  ;;  %v518_v60 = vsel %vm59_vm0, %v1803_v45, %v1777_v56  ;;  %v533_v36 = vpop.permute.xlu0 %532 }
 0x23f   :  { %v527_v49 = vmul.f32 %v518_v60, %v70_v43  ;;  %v695_v41 = vpack.c.bf16 %v609_v18, %v1714_v30  ;;  %v545_v52 = vsel %vm96_vm1, %v1827_v57, %v533_v36  ;;  %v1266_v57 = vld [vmem:[%s2057_s6 + $0xe8] sm:$0xff]  ;;  %v1243_v60 = vld [vmem:[%s2057_s6 + $0x30] sm:$0xff]  ;;  %v1261_v18 = vld [vmem:[%s2057_s6 + $0xc0] sm:$0xff] }
 0x240   :  { %v697_v25 = vpack.c.bf16 %v611_v11, %v1698_v28  ;;  %v698_v10 = vpack.c.bf16 %v612_v9, %v1724_v38  ;;  %v630_v28 = vmul.f32 %v621_v31, %v253_v59  ;;  %v693_v38 = vpack.c.bf16 %v590_v7, %v569_v0  ;;  %v512_v29 = vpop.permute.xlu2 %511  ;;  %v1267_v11 = vld [vmem:[%s2057_s6 + $0xf0] sm:$0xff] }
 0x241   :  { %v601_v59 = vsel %vm202_vm5, %v595_v27, %v1787_v42  ;;  %v689_v43 = vpack.c.bf16 %v548_v23, %v527_v49  ;;  %v568_v9 = vmul.f32 %v559_v21, %v143_v34  ;;  %v2064_v31 = vperm.slane %v1545_v1, 3  ;;  %v1264_v23 = vld [vmem:[%s2057_s6 + $0xd8] sm:$0xff]  ;;  %v1239_v49 = vld [vmem:[%s2057_s6 + $0x10] sm:$0xff] }
 0x242   :  { %763 = vmatpush.bf16.msrb.mxu2 %v697_v25  ;;  %776 = vmatpush.bf16.msrb.mxu3 %v698_v10  ;;  %v517_v34 = vsel %vm59_vm0, %v512_v29, %v1803_v45  ;;  %v2066_v25 = vperm.slane %v1545_v1, 1  ;;  %v1265_v1 = vld [vmem:[%s2057_s6 + $0xe0] sm:$0xff] }
 0x243   :  { %v526_v27 = vmul.f32 %v517_v34, %v2068_v39 }
 0x244   :  { %v637_v44 = vpop.permute.xlu1 %636 }
 0x245   :  { %v642_v13 = vsel %vm276_vm6, %v1785_v63, %v637_v44  ;;  %v643_v56 = vsel %vm276_vm6, %v637_v44, %v1783_v40  ;;  %v528_v63 = vmul.f32 %v519_v61, %v71_v48  ;;  %v707_v40 = vld [vmem:[%s2056_s3] sm:$0xff]  ;;  %v566_v48 = vsel %vm133_vm3, %v1805_v5, %v554_v55  ;;  %v1256_v61 = vld [vmem:[%s2057_s6 + $0x98] sm:$0xff]  ;;  %v1250_v44 = vld [vmem:[%s2057_s6 + $0x68] sm:$0xff] }
 0x246   :  { %v651_v17 = vmul.f32 %v642_v13, %v290_v20  ;;  %v652_v58 = vmul.f32 %v643_v56, %v291_v19  ;;  %764 = vmatpush.bf16.msrb.mxu2 %v693_v38  ;;  %777 = vmatpush.bf16.msrb.mxu3 %v694_v2  ;;  %v610_v20 = vmul.f32 %v601_v59, %v217_v37  ;;  %v2065_v55 = vperm.slane %v1606_v50, 1  ;;  %v1251_v38 = vld [vmem:[%s2057_s6 + $0x70] sm:$0xff]  ;;  %v1249_v13 = vld [vmem:[%s2057_s6 + $0x60] sm:$0xff]  ;;  %v1254_v56 = vld [vmem:[%s2057_s6 + $0x88] sm:$0xff] }
 0x247   :  { %v690_v32 = vpack.c.bf16 %v549_v51, %v528_v63  ;;  %v708_v37 = vpack.c.bf16 %v707_v40, %v707_v40  ;;  %v567_v26 = vmul.f32 %v566_v48, %v142_v8  ;;  %v538_v8 = vsel %vm96_vm1, %v533_v36, %v1807_v15  ;;  %v1255_v2 = vld [vmem:[%s2057_s6 + $0x90] sm:$0xff]  ;;  %v1241_v51 = vld [vmem:[%s2057_s6 + $0x20] sm:$0xff] }
 0x248   :  { %v699_v42 = vpack.c.bf16 %v651_v17, %v630_v28  ;;  %v700_v19 = vpack.c.bf16 %v652_v58, %v631_v35  ;;  %v696_v5 = vpack.c.bf16 %v610_v20, %v1716_v12  ;;  %v546_v45 = vmul.f32 %v545_v52, %v2065_v55  ;;  %v1263_v59 = vld [vmem:[%s2057_s6 + $0xd0] sm:$0xff]  ;;  %v1262_v35 = vld [vmem:[%s2057_s6 + $0xc8] sm:$0xff]  ;;  %v1240_v17 = vld [vmem:[%s2057_s6 + $0x18] sm:$0xff] }
 0x249   :  { %v547_v10 = vmul.f32 %v538_v8, %v2066_v25  ;;  %v1248_v58 = vld [vmem:[%s2057_s6 + $0x58] sm:$0xff]  ;;  %v1247_v63 = vld [vmem:[%s2057_s6 + $0x50] sm:$0xff]  ;;  %v1253_v40 = vld [vmem:[%s2057_s6 + $0x80] sm:$0xff] }
 0x24a   :  { %736 = vmatpush.bf16.msrb.mxu0 %v699_v42  ;;  %749 = vmatpush.bf16.msrb.mxu1 %v700_v19  ;;  %v1238_v20 = vld [vmem:[%s2057_s6 + $0x8] sm:$0xff]  ;;  %v1237_v19 = vld [vmem:[%s2057_s6] sm:$0xff] }
 0x24b   :  { %765 = vmatpush.bf16.msrb.mxu2 %v689_v43  ;;  %778 = vmatpush.bf16.msrb.mxu3 %v690_v32  ;;  %v688_v28 = vpack.c.bf16 %v547_v10, %v526_v27  ;;  %v1246_v42 = vld [vmem:[%s2057_s6 + $0x48] sm:$0xff] }
 0x24c   :  { %v575_v6 = vpop.permute.xlu1 %574 }
 0x24d   :  { %v580_v30 = vsel %vm170_vm4, %v575_v6, %v1793_v14  ;;  %v587_v12 = vsel %vm170_vm4, %v1809_v4, %v575_v6  ;;  %v524_v4 = vsel %vm59_vm0, %v1817_v53, %v512_v29  ;;  %v2067_v53 = vperm.slane %v1606_v50, 0  ;;  %v1257_v50 = vld [vmem:[%s2057_s6 + $0xa0] sm:$0xff] }
 0x24e   :  { %v588_v7 = vmul.f32 %v587_v12, %v179_v16  ;;  %v589_v22 = vmul.f32 %v580_v30, %v2064_v31  ;;  %1107 = vmatmul.msk.bf16.vlgmr.msrb.gmra.mxu2 %vm715_vm12, %v708_v37  ;;  %1108 = vmatmul.msk.bf16.vlgmr.msrb.gmra.mxu3 %vm715_vm12, %v708_v37  ;;  %v1258_v16 = vld [vmem:[%s2057_s6 + $0xa8] sm:$0xff] }
 0x24f   :  { %1070 = vmatpush.bf16.msra.mxu2 %v1260_v24  ;;  %1083 = vmatpush.bf16.msra.mxu3 %v1268_v46  ;;  %v525_v0 = vmul.f32 %v524_v4, %v2067_v53  ;;  %v1245_v24 = vld [vmem:[%s2057_s6 + $0x40] sm:$0xff] }
 0x250   :  { %737 = vmatpush.bf16.msrb.mxu0 %v695_v41  ;;  %750 = vmatpush.bf16.msrb.mxu1 %v696_v5  ;;  %v691_v14 = vpack.c.bf16 %v588_v7, %v567_v26  ;;  %v692_v15 = vpack.c.bf16 %v589_v22, %v568_v9 }
 0x251   :  { %v687_v62 = vpack.c.bf16 %v546_v45, %v525_v0 }
 0x253   :  { %1071 = vmatpush.bf16.msra.mxu2 %v1259_v47  ;;  %1084 = vmatpush.bf16.msra.mxu3 %v1267_v11 }
 0x254   :  { %738 = vmatpush.bf16.msrb.mxu0 %v691_v14  ;;  %751 = vmatpush.bf16.msrb.mxu1 %v692_v15  ;;  %v713_v46 = vpop.permute.xlu1 %712 }
 0x257   :  { %1072 = vmatpush.bf16.msra.mxu2 %v1258_v16  ;;  %1085 = vmatpush.bf16.msra.mxu3 %v1266_v57 }
 0x258   :  { %739 = vmatpush.bf16.msrb.mxu0 %v687_v62  ;;  %752 = vmatpush.bf16.msrb.mxu1 %v688_v28 }
 0x25b   :  { %1073 = vmatpush.bf16.msra.mxu2 %v1257_v50  ;;  %1086 = vmatpush.bf16.msra.mxu3 %v1265_v1 }
 0x25c   :  { %1044 = vmatpush.bf16.msra.mxu0 %v1244_v54  ;;  %1057 = vmatpush.bf16.msra.mxu1 %v1252_v3 }
 0x25d   :  { %1105 = vmatmul.msk.bf16.vlgmr.msrb.gmra.mxu0 %vm715_vm12, %v708_v37  ;;  %1106 = vmatmul.msk.bf16.vlgmr.msrb.gmra.mxu1 %vm715_vm12, %v708_v37 }
 0x25f   :  { %1074 = vmatpush.bf16.msra.mxu2 %v1256_v61  ;;  %1087 = vmatpush.bf16.msra.mxu3 %v1264_v23 }
 0x260   :  { %1045 = vmatpush.bf16.msra.mxu0 %v1243_v60  ;;  %1058 = vmatpush.bf16.msra.mxu1 %v1251_v38 }
 0x263   :  { %1075 = vmatpush.bf16.msra.mxu2 %v1255_v2  ;;  %1088 = vmatpush.bf16.msra.mxu3 %v1263_v59 }
 0x264   :  { %1046 = vmatpush.bf16.msra.mxu0 %v1242_v33  ;;  %1059 = vmatpush.bf16.msra.mxu1 %v1250_v44 }
 0x267   :  { %1076 = vmatpush.bf16.msra.mxu2 %v1254_v56  ;;  %1089 = vmatpush.bf16.msra.mxu3 %v1262_v35 }
 0x268   :  { %1047 = vmatpush.bf16.msra.mxu0 %v1241_v51  ;;  %1060 = vmatpush.bf16.msra.mxu1 %v1249_v13 }
 0x26b   :  { %1077 = vmatpush.bf16.msra.mxu2 %v1253_v40  ;;  %1090 = vmatpush.bf16.msra.mxu3 %v1261_v18 }
 0x26c   :  { %1048 = vmatpush.bf16.msra.mxu0 %v1240_v17  ;;  %1061 = vmatpush.bf16.msra.mxu1 %v1248_v58 }
 0x270   :  { %1049 = vmatpush.bf16.msra.mxu0 %v1239_v49  ;;  %1062 = vmatpush.bf16.msra.mxu1 %v1247_v63 }
 0x274   :  { %1050 = vmatpush.bf16.msra.mxu0 %v1238_v20  ;;  %1063 = vmatpush.bf16.msra.mxu1 %v1246_v42 }
 0x278   :  { %1051 = vmatpush.bf16.msra.mxu0 %v1237_v19  ;;  %1064 = vmatpush.bf16.msra.mxu1 %v1245_v24 }
 0x2d1   :  { %v767_v48 = vpop.f32.mrf.mxu2  ;;  %v780_v43 = vpop.f32.mrf.mxu3 }
 0x2d2   :  { %v768_v32 = vadd.f32 %v767_v48, %v713_v46  ;;  %v781_v21 = vadd.f32 %v780_v43, %v713_v46 }
 0x2d4   :  { %v786_v36 = vpack.c.bf16 %v768_v32, %v768_v32  ;;  %v787_v37 = vpack.c.bf16 %v781_v21, %v781_v21 }
 0x2d6   :  { %1078 = vmatmul.bf16.vlgmr.msra.gmra.mxu2 %v786_v36  ;;  %1091 = vmatmul.bf16.vlgmr.msra.gmra.mxu3 %v787_v37 }
 0x2d9   :  { %v769_v5 = vpop.f32.mrf.mxu2  ;;  %v782_v47 = vpop.f32.mrf.mxu3 }
 0x2da   :  { %v741_v29 = vpop.f32.mrf.mxu0  ;;  %v754_v26 = vpop.f32.mrf.mxu1 }
 0x2db   :  { %v742_v6 = vadd.f32 %v741_v29, %v713_v46  ;;  %v755_v41 = vadd.f32 %v754_v26, %v713_v46 }
 0x2dd   :  { %v784_v11 = vpack.c.bf16 %v742_v6, %v742_v6  ;;  %v785_v9 = vpack.c.bf16 %v755_v41, %v755_v41 }
 0x2df   :  { %1052 = vmatmul.bf16.vlgmr.msra.gmra.mxu0 %v784_v11  ;;  %1065 = vmatmul.bf16.vlgmr.msra.gmra.mxu1 %v785_v9 }
 0x2e2   :  { %v743_v8 = vpop.f32.mrf.mxu0  ;;  %v756_v30 = vpop.f32.mrf.mxu1 }
 0x359   :  { %v1079_v31 = vpop.f32.mrf.mxu2  ;;  %v1092_v22 = vpop.f32.mrf.mxu3 }
 0x35c   :  { %v1053_v12 = vpop.f32.mrf.mxu0  ;;  %v1066_v52 = vpop.f32.mrf.mxu1 }
 0x35d   :  { %v1067_v7 = vadd.f32 %v1066_v52, %v1053_v12 }
 0x35f   :  { %v1080_v34 = vadd.f32 %v1079_v31, %v1067_v7 }
 0x361   :  { %v1093_v4 = vadd.f32 %v1092_v22, %v1080_v34  ;;  %v1081_v16 = vpop.f32.mrf.mxu2  ;;  %v1094_v57 = vpop.f32.mrf.mxu3 }
 0x363   :  { %1096 = vst [vmem:[%s2058_s7] sm:$0xff] %v1093_v4 }
 0x364   :  { %v1055_v14 = vpop.f32.mrf.mxu0  ;;  %v1068_v15 = vpop.f32.mrf.mxu1 }

</bundles_post_ra>
